<compile_context>
chip_gen: v7x
topology: tpu7x:2x2x1
jax: 0.10.0
libtpu: 0.0.40
codegen_flags: <defaults>
</compile_context>

<pallas_src>
import functools

import jax
import jax.numpy as jnp
from jax import lax
from jax.experimental import pallas as pl
from jax.experimental.pallas import tpu as pltpu

_BN_EPS = 1e-3  # matches BatchNorm2d(48, eps=0.001)


def _fused_kernel(x_ref, w_ref, gamma_ref, beta_ref, o_ref, *, m_true):
    # x_ref:     (Mp, K)  im2col matrix (rows zero-padded past m_true)
    # w_ref:     (K, Cp)  conv weights reshaped (kh,kw,cin)-major, Cout padded to Cp=128
    # gamma_ref: (1, Cp)
    # beta_ref:  (1, Cp)
    # o_ref:     (Mp, Cp)

    # ReLU on the input.  ReLU commutes with the im2col gather because the
    # spatial zero-padding stays zero under ReLU.
    x = jnp.maximum(x_ref[...], 0.0)

    # Single MXU matmul: (Mp, 144) x (144, 128) -> f32 accumulator.
    acc = jnp.dot(x, w_ref[...], preferred_element_type=jnp.float32)

    # BatchNorm (training-mode batch statistics, biased variance).
    # Padded rows are all-zero, so dividing the raw sums by the true row
    # count gives exact statistics over the real m_true rows.
    inv_m = 1.0 / m_true
    mean = jnp.sum(acc, axis=0, keepdims=True) * inv_m             # (1, Cp)
    ex2 = jnp.sum(acc * acc, axis=0, keepdims=True) * inv_m        # (1, Cp)
    var = ex2 - mean * mean
    inv = lax.rsqrt(var + _BN_EPS)                                  # EUP
    scale = gamma_ref[...] * inv                                    # (1, Cp)
    shift = beta_ref[...] - mean * scale                            # (1, Cp)

    # Normalize + affine + final ReLU in one lane-dense FMA pass.
    o_ref[...] = jnp.maximum(acc * scale + shift, 0.0)


@jax.jit
def fused_relu_conv_bn_relu(x_nchw, w_hwio, gamma, beta):
    """x_nchw: (N, Cin, H, W);  w_hwio: (3, 3, Cin, Cout);  gamma/beta: (Cout,)."""
    N, Cin, H, W = x_nchw.shape
    KH, KW, _, Cout = w_hwio.shape
    Cp = 128                           # lane-dense padded output-channel count
    M = N * H * W                      # true rows of the im2col matrix
    Mp = ((M + 7) // 8) * 8            # sublane-aligned row count
    K = KH * KW * Cin                  # contraction dim (= 144 for 3x3x16)

    # --- wrapper-side layout plumbing (XLA): NCHW -> NHWC, pad, im2col -------
    x_nhwc = jnp.transpose(x_nchw, (0, 2, 3, 1)).astype(jnp.float32)
    x_pad = jnp.pad(x_nhwc, ((0, 0), (1, 1), (1, 1), (0, 0)))
    # column order = (kh, kw, cin), matching w_hwio.reshape(K, Cout)
    cols = [x_pad[:, kh:kh + H, kw:kw + W, :]
            for kh in range(KH) for kw in range(KW)]
    im2col = jnp.concatenate(cols, axis=-1).reshape(M, K)
    im2col = jnp.pad(im2col, ((0, Mp - M), (0, 0)))

    w2 = w_hwio.astype(jnp.float32).reshape(K, Cout)
    w2 = jnp.pad(w2, ((0, 0), (0, Cp - Cout)))
    gamma2 = jnp.pad(gamma.astype(jnp.float32).reshape(1, Cout),
                     ((0, 0), (0, Cp - Cout)))
    beta2 = jnp.pad(beta.astype(jnp.float32).reshape(1, Cout),
                    ((0, 0), (0, Cp - Cout)))

    kernel = functools.partial(_fused_kernel, m_true=M)

    out = pl.pallas_call(
        kernel,
        out_shape=jax.ShapeDtypeStruct((Mp, Cp), jnp.float32),
        grid_spec=pltpu.PrefetchScalarGridSpec(
            num_scalar_prefetch=0,
            grid=(1,),
            in_specs=[
                pl.BlockSpec((Mp, K), lambda i: (0, 0)),
                pl.BlockSpec((K, Cp), lambda i: (0, 0)),
                pl.BlockSpec((1, Cp), lambda i: (0, 0)),
                pl.BlockSpec((1, Cp), lambda i: (0, 0)),
            ],
            out_specs=pl.BlockSpec((Mp, Cp), lambda i: (0, 0)),
        ),
        compiler_params=pltpu.CompilerParams(
            dimension_semantics=("arbitrary",)),
    )(im2col, w2, gamma2, beta2)

    # Slice the real rows / channels back out, restore NCHW.
    out = out[:M, :Cout].reshape(N, H, W, Cout)
    return jnp.transpose(out, (0, 3, 1, 2))


if __name__ == "__main__":
    key = jax.random.PRNGKey(0)
    k_x, k_w, k_g, k_b = jax.random.split(key, 4)

    # Shapes consistent with the module: input (1, 16, 14, 14), Conv2d(16->48, 3x3, pad 1).
    N, Cin, H, W = 1, 16, 14, 14
    Cout = 48

    x = jax.random.normal(k_x, (N, Cin, H, W), dtype=jnp.float32)

    # Deterministic synthetic parameters (not a checkpoint).
    w_hwio = jax.random.normal(k_w, (3, 3, Cin, Cout), dtype=jnp.float32) * 0.1
    gamma = 1.0 + 0.1 * jax.random.normal(k_g, (Cout,), dtype=jnp.float32)
    beta = 0.1 * jax.random.normal(k_b, (Cout,), dtype=jnp.float32)

    out = fused_relu_conv_bn_relu(x, w_hwio, gamma, beta)
    jax.block_until_ready(out)
    assert out.shape == (N, Cout, H, W)

    # Pure-JAX reference of the same forward pass (training-mode BN).
    xr = jnp.maximum(x, 0.0)
    conv = lax.conv_general_dilated(
        xr, w_hwio, window_strides=(1, 1), padding=((1, 1), (1, 1)),
        dimension_numbers=("NCHW", "HWIO", "NCHW"))
    mean = conv.mean(axis=(0, 2, 3), keepdims=True)
    var = ((conv - mean) ** 2).mean(axis=(0, 2, 3), keepdims=True)
    ref = jnp.maximum(
        (conv - mean) * lax.rsqrt(var + _BN_EPS)
        * gamma.reshape(1, -1, 1, 1) + beta.reshape(1, -1, 1, 1), 0.0)
    assert bool(jnp.allclose(out, ref, atol=2e-3, rtol=2e-3))

    print("KERNEL_OK")
</pallas_src>

<mosaic_0001>
module attributes {stable_mosaic.version = 11 : i64} {
  func.func @_fused_kernel(%arg0: i32, %arg1: memref<200x144xf32, #tpu.memory_space<vmem>>, %arg2: memref<144x128xf32, #tpu.memory_space<vmem>>, %arg3: memref<1x128xf32, #tpu.memory_space<vmem>>, %arg4: memref<1x128xf32, #tpu.memory_space<vmem>>, %arg5: memref<200x128xf32, #tpu.memory_space<vmem>>) attributes {dimension_semantics = [#tpu.dimension_semantics<arbitrary>], iteration_bounds = array<i64: 1>, scalar_prefetch = 0 : i64, scratch_operands = 0 : i64, tpu.core_type = #tpu.core_type<tc>, window_params = [{pipeline_mode = #tpu.pipeline_mode<synchronous>, transform_indices = @transform_0, window_bounds = array<i64: 200, 144>}, {pipeline_mode = #tpu.pipeline_mode<synchronous>, transform_indices = @transform_1, window_bounds = array<i64: 144, 128>}, {pipeline_mode = #tpu.pipeline_mode<synchronous>, transform_indices = @transform_2, window_bounds = array<i64: 1, 128>}, {pipeline_mode = #tpu.pipeline_mode<synchronous>, transform_indices = @transform_3, window_bounds = array<i64: 1, 128>}, {pipeline_mode = #tpu.pipeline_mode<synchronous>, transform_indices = @transform_4, window_bounds = array<i64: 200, 128>}]} {
    %c0 = arith.constant 0 : index
    %c0_0 = arith.constant 0 : index
    %0 = vector.load %arg1[%c0, %c0_0] : memref<200x144xf32, #tpu.memory_space<vmem>>, vector<200x144xf32>
    %cst = arith.constant 0.000000e+00 : f32
    %1 = vector.broadcast %cst : f32 to vector<200x144xf32>
    %2 = arith.maximumf %0, %1 : vector<200x144xf32>
    %c0_1 = arith.constant 0 : index
    %c0_2 = arith.constant 0 : index
    %3 = vector.load %arg2[%c0_1, %c0_2] : memref<144x128xf32, #tpu.memory_space<vmem>>, vector<144x128xf32>
    %cst_3 = arith.constant dense<0.000000e+00> : vector<200x128xf32>
    %4 = tpu.matmul %2, %3, %cst_3 {dimension_numbers = #tpu.dot_dimension_numbers<[1], [0], [0], [1], [0, 0, 1, 1], [], []>} : vector<200x144xf32>, vector<144x128xf32>, vector<200x128xf32> -> vector<200x128xf32>
    %cst_4 = arith.constant dense<0.000000e+00> : vector<128xf32>
    %5 = vector.multi_reduction <add>, %4, %cst_4 [0] : vector<200x128xf32> to vector<128xf32>
    %6 = vector.shape_cast %5 : vector<128xf32> to vector<1x128xf32>
    %cst_5 = arith.constant 0.00510204071 : f32
    %7 = vector.broadcast %cst_5 : f32 to vector<1x128xf32>
    %8 = arith.mulf %6, %7 : vector<1x128xf32>
    %9 = arith.mulf %4, %4 : vector<200x128xf32>
    %cst_6 = arith.constant dense<0.000000e+00> : vector<128xf32>
    %10 = vector.multi_reduction <add>, %9, %cst_6 [0] : vector<200x128xf32> to vector<128xf32>
    %11 = vector.shape_cast %10 : vector<128xf32> to vector<1x128xf32>
    %cst_7 = arith.constant 0.00510204071 : f32
    %12 = vector.broadcast %cst_7 : f32 to vector<1x128xf32>
    %13 = arith.mulf %11, %12 : vector<1x128xf32>
    %14 = arith.mulf %8, %8 : vector<1x128xf32>
    %15 = arith.subf %13, %14 : vector<1x128xf32>
    %cst_8 = arith.constant 1.000000e-03 : f32
    %16 = vector.broadcast %cst_8 : f32 to vector<1x128xf32>
    %17 = arith.addf %15, %16 : vector<1x128xf32>
    %18 = math.rsqrt %17 : vector<1x128xf32>
    %c0_9 = arith.constant 0 : index
    %c0_10 = arith.constant 0 : index
    %19 = vector.load %arg3[%c0_9, %c0_10] : memref<1x128xf32, #tpu.memory_space<vmem>>, vector<1x128xf32>
    %20 = arith.mulf %19, %18 : vector<1x128xf32>
    %c0_11 = arith.constant 0 : index
    %c0_12 = arith.constant 0 : index
    %21 = vector.load %arg4[%c0_11, %c0_12] : memref<1x128xf32, #tpu.memory_space<vmem>>, vector<1x128xf32>
    %22 = arith.mulf %8, %20 : vector<1x128xf32>
    %23 = arith.subf %21, %22 : vector<1x128xf32>
    %24 = vector.broadcast %20 : vector<1x128xf32> to vector<200x128xf32>
    %25 = arith.mulf %4, %24 : vector<200x128xf32>
    %26 = vector.broadcast %23 : vector<1x128xf32> to vector<200x128xf32>
    %27 = arith.addf %25, %26 : vector<200x128xf32>
    %cst_13 = arith.constant 0.000000e+00 : f32
    %28 = vector.broadcast %cst_13 : f32 to vector<200x128xf32>
    %29 = arith.maximumf %27, %28 : vector<200x128xf32>
    %c0_14 = arith.constant 0 : index
    %c0_15 = arith.constant 0 : index
    %30 = vector.load %arg5[%c0_14, %c0_15] : memref<200x128xf32, #tpu.memory_space<vmem>>, vector<200x128xf32>
    tpu.vector_store %arg5[%c0_14, %c0_15], %29 {strides = array<i32>} : memref<200x128xf32, #tpu.memory_space<vmem>>, vector<200x128xf32>,
    return
  }
  func.func @transform_0(%arg0: i32) -> (i32, i32) {
    %c0_i32 = arith.constant 0 : i32
    %c0_i32_0 = arith.constant 0 : i32
    %c0_i32_1 = arith.constant 0 : i32
    return %c0_i32, %c0_i32_0 : i32, i32
  }
  func.func @transform_1(%arg0: i32) -> (i32, i32) {
    %c0_i32 = arith.constant 0 : i32
    %c0_i32_0 = arith.constant 0 : i32
    %c0_i32_1 = arith.constant 0 : i32
    return %c0_i32, %c0_i32_0 : i32, i32
  }
  func.func @transform_2(%arg0: i32) -> (i32, i32) {
    %c0_i32 = arith.constant 0 : i32
    %c0_i32_0 = arith.constant 0 : i32
    %c0_i32_1 = arith.constant 0 : i32
    return %c0_i32, %c0_i32_0 : i32, i32
  }
  func.func @transform_3(%arg0: i32) -> (i32, i32) {
    %c0_i32 = arith.constant 0 : i32
    %c0_i32_0 = arith.constant 0 : i32
    %c0_i32_1 = arith.constant 0 : i32
    return %c0_i32, %c0_i32_0 : i32, i32
  }
  func.func @transform_4(%arg0: i32) -> (i32, i32) {
    %c0_i32 = arith.constant 0 : i32
    %c0_i32_0 = arith.constant 0 : i32
    %c0_i32_1 = arith.constant 0 : i32
    return %c0_i32, %c0_i32_0 : i32, i32
  }
}

</mosaic_0001>

<bundles_post_ra>
// kernel: fused_relu_conv_bn_relu.1
= control target key start
LH: loop header
LB: loop body
LE: loop exit
PB: predicated region body
PF: predicated region fallthrough
CT: control target
= control target key end

     0   :  { %v686_v0 = vmov 0.0|0.0   ;;  %vm135_vm0 = vcmask 130048   ;;  %s1190_s1 = inlined_call_operand.vmem [shape: f32[144,128], index: 1, kind: input, shape index: {}]   ;;  %s1191_s0 = inlined_call_operand.vmem [shape: f32[200,144], index: 0, kind: input, shape index: {}]   ;;  %s1192_s2 = inlined_call_operand.vmem [shape: f32[1,128], index: 2, kind: input, shape index: {}]   ;;  %s1193_s3 = inlined_call_operand.vmem [shape: f32[1,128], index: 3, kind: input, shape index: {}]   ;;  %s1194_s4 = inlined_call_operand.vmem [shape: f32[200,128], index: 4, kind: output, shape index: {}]  }
   0x1   :  { %638 = vmatprep.subr.bf16.mxu0 %v686_v0  ;;  %v117_v1 = vld [vmem:[%s1190_s1] sm:$0xff]  ;;  %v118_v2 = vld [vmem:[%s1190_s1 + $0x8] sm:$0xff]  ;;  %v119_v3 = vld [vmem:[%s1190_s1 + $0x10] sm:$0xff]  ;;  %665 = vmatprep.subr.bf16.mxu1 %v686_v0 }
   0x2   :  { %v639_v4 = vpack.c.bf16 %v118_v2, %v117_v1  ;;  %v120_v5 = vld [vmem:[%s1190_s1 + $0x18] sm:$0xff]  ;;  %v121_v7 = vld [vmem:[%s1190_s1 + $0x20] sm:$0xff]  ;;  %v122_v8 = vld [vmem:[%s1190_s1 + $0x28] sm:$0xff] }
   0x3   :  { %v642_v6 = vpack.c.bf16 %v120_v5, %v119_v3  ;;  %v18_v9 = vld [vmem:[%s1191_s0 + $0x8] sm:$0xff]  ;;  %v645_v10 = vpack.c.bf16 %v122_v8, %v121_v7  ;;  %v123_v12 = vld [vmem:[%s1190_s1 + $0x30] sm:$0xff]  ;;  %v124_v13 = vld [vmem:[%s1190_s1 + $0x38] sm:$0xff] }
   0x4   :  { %640 = vmatpush1.bf16.msra.mxu0 %v639_v4  ;;  %674 = vmatpush1.bf16.msra.mxu1 %v639_v4  ;;  %v68_v11 = vmax.f32 %v18_v9, 0.0  ;;  %v44_v14 = vld [vmem:[%s1191_s0 + $0xd8] sm:$0xff]  ;;  %v648_v15 = vpack.c.bf16 %v124_v13, %v123_v12  ;;  %v125_v17 = vld [vmem:[%s1190_s1 + $0x40] sm:$0xff]  ;;  %v126_v18 = vld [vmem:[%s1190_s1 + $0x48] sm:$0xff] }
   0x5   :  { %641 = vmatprep.subr.bf16.mxu0 %v686_v0  ;;  %666 = vmatprep.subr.bf16.mxu1 %v686_v0  ;;  %v94_v16 = vmax.f32 %v44_v14, 0.0  ;;  %v651_v19 = vpack.c.bf16 %v126_v18, %v125_v17  ;;  %v127_v20 = vld [vmem:[%s1190_s1 + $0x50] sm:$0xff]  ;;  %v128_v21 = vld [vmem:[%s1190_s1 + $0x58] sm:$0xff]  ;;  %v129_v23 = vld [vmem:[%s1190_s1 + $0x60] sm:$0xff] }
   0x6   :  { %613 = vmatprep.mubr.msk.f32.mxu0 %vm135_vm0, %v68_v11  ;;  %v654_v22 = vpack.c.bf16 %v128_v21, %v127_v20  ;;  %v130_v24 = vld [vmem:[%s1190_s1 + $0x68] sm:$0xff]  ;;  %v131_v26 = vld [vmem:[%s1190_s1 + $0x70] sm:$0xff]  ;;  %v132_v27 = vld [vmem:[%s1190_s1 + $0x78] sm:$0xff] }
   0x7   :  { %626 = vmatprep.mubr.msk.f32.mxu1 %vm135_vm0, %v94_v16  ;;  %v657_v25 = vpack.c.bf16 %v130_v24, %v129_v23  ;;  %v660_v28 = vpack.c.bf16 %v132_v27, %v131_v26  ;;  %v133_v29 = vld [vmem:[%s1190_s1 + $0x80] sm:$0xff]  ;;  %v134_v30 = vld [vmem:[%s1190_s1 + $0x88] sm:$0xff]  ;;  %v43_v33 = vld [vmem:[%s1191_s0 + $0xd0] sm:$0xff] }
   0x8   :  { %643 = vmatpush1.bf16.msra.mxu0 %v642_v6  ;;  %675 = vmatpush1.bf16.msra.mxu1 %v642_v6  ;;  %v663_v31 = vpack.c.bf16 %v134_v30, %v133_v29  ;;  %v17_v32 = vld [vmem:[%s1191_s0] sm:$0xff]  ;;  %v20_v34 = vld [vmem:[%s1191_s0 + $0x18] sm:$0xff]  ;;  %v46_v35 = vld [vmem:[%s1191_s0 + $0xe8] sm:$0xff]  ;;  %v93_v37 = vmax.f32 %v43_v33, 0.0 }
   0x9   :  { %644 = vmatprep.subr.bf16.mxu0 %v686_v0  ;;  %667 = vmatprep.subr.bf16.mxu1 %v686_v0  ;;  %v67_v36 = vmax.f32 %v17_v32, 0.0  ;;  %v70_v38 = vmax.f32 %v20_v34, 0.0  ;;  %v19_v39 = vld [vmem:[%s1191_s0 + $0x10] sm:$0xff]  ;;  %v96_v40 = vmax.f32 %v46_v35, 0.0  ;;  %v45_v41 = vld [vmem:[%s1191_s0 + $0xe0] sm:$0xff]  ;;  %v22_v42 = vld [vmem:[%s1191_s0 + $0x28] sm:$0xff] }
   0xa   :  { %v48_v43 = vld [vmem:[%s1191_s0 + $0xf8] sm:$0xff]  ;;  %v69_v44 = vmax.f32 %v19_v39, 0.0  ;;  %v95_v45 = vmax.f32 %v45_v41, 0.0  ;;  %v72_v46 = vmax.f32 %v22_v42, 0.0  ;;  %v21_v47 = vld [vmem:[%s1191_s0 + $0x20] sm:$0xff]  ;;  %v47_v49 = vld [vmem:[%s1191_s0 + $0xf0] sm:$0xff] }
   0xb   :  { %v98_v48 = vmax.f32 %v48_v43, 0.0  ;;  %v24_v50 = vld [vmem:[%s1191_s0 + $0x38] sm:$0xff]  ;;  %v50_v51 = vld [vmem:[%s1191_s0 + $0x108] sm:$0xff]  ;;  %v71_v52 = vmax.f32 %v21_v47, 0.0  ;;  %v97_v53 = vmax.f32 %v47_v49, 0.0  ;;  %v23_v55 = vld [vmem:[%s1191_s0 + $0x30] sm:$0xff] }
   0xc   :  { %646 = vmatpush1.bf16.msra.mxu0 %v645_v10  ;;  %676 = vmatpush1.bf16.msra.mxu1 %v645_v10  ;;  %v74_v54 = vmax.f32 %v24_v50, 0.0  ;;  %v100_v56 = vmax.f32 %v50_v51, 0.0  ;;  %v49_v57 = vld [vmem:[%s1191_s0 + $0x100] sm:$0xff]  ;;  %v26_v58 = vld [vmem:[%s1191_s0 + $0x48] sm:$0xff]  ;;  %v52_v59 = vld [vmem:[%s1191_s0 + $0x118] sm:$0xff]  ;;  %v73_v60 = vmax.f32 %v23_v55, 0.0 }
   0xd   :  { %647 = vmatprep.subr.bf16.mxu0 %v686_v0  ;;  %668 = vmatprep.subr.bf16.mxu1 %v686_v0  ;;  %v99_v61 = vmax.f32 %v49_v57, 0.0  ;;  %v76_v62 = vmax.f32 %v26_v58, 0.0  ;;  %v25_v63 = vld [vmem:[%s1191_s0 + $0x40] sm:$0xff]  ;;  %v51_v1 = vld [vmem:[%s1191_s0 + $0x110] sm:$0xff]  ;;  %v28_v2 = vld [vmem:[%s1191_s0 + $0x58] sm:$0xff] }
   0xe   :  { %v54_v3 = vld [vmem:[%s1191_s0 + $0x128] sm:$0xff]  ;;  %v75_v4 = vmax.f32 %v25_v63, 0.0  ;;  %v101_v5 = vmax.f32 %v51_v1, 0.0  ;;  %v78_v6 = vmax.f32 %v28_v2, 0.0  ;;  %v27_v7 = vld [vmem:[%s1191_s0 + $0x50] sm:$0xff]  ;;  %v53_v9 = vld [vmem:[%s1191_s0 + $0x120] sm:$0xff] }
   0xf   :  { %v104_v8 = vmax.f32 %v54_v3, 0.0  ;;  %v30_v10 = vld [vmem:[%s1191_s0 + $0x68] sm:$0xff]  ;;  %v56_v11 = vld [vmem:[%s1191_s0 + $0x138] sm:$0xff]  ;;  %v77_v12 = vmax.f32 %v27_v7, 0.0  ;;  %v103_v13 = vmax.f32 %v53_v9, 0.0  ;;  %v55_v17 = vld [vmem:[%s1191_s0 + $0x130] sm:$0xff] }
  0x10   :  { %649 = vmatpush1.bf16.msra.mxu0 %v648_v15  ;;  %677 = vmatpush1.bf16.msra.mxu1 %v648_v15  ;;  %v80_v14 = vmax.f32 %v30_v10, 0.0  ;;  %v29_v15 = vld [vmem:[%s1191_s0 + $0x60] sm:$0xff]  ;;  %v106_v16 = vmax.f32 %v56_v11, 0.0  ;;  %v32_v18 = vld [vmem:[%s1191_s0 + $0x78] sm:$0xff]  ;;  %v105_v21 = vmax.f32 %v55_v17, 0.0  ;;  %v31_v23 = vld [vmem:[%s1191_s0 + $0x70] sm:$0xff] }
  0x11   :  { %650 = vmatprep.subr.bf16.mxu0 %v686_v0  ;;  %669 = vmatprep.subr.bf16.mxu1 %v686_v0  ;;  %v79_v20 = vmax.f32 %v29_v15, 0.0  ;;  %v34_v26 = vld [vmem:[%s1191_s0 + $0x88] sm:$0xff]  ;;  %v60_v27 = vld [vmem:[%s1191_s0 + $0x158] sm:$0xff]  ;;  %v59_v33 = vld [vmem:[%s1191_s0 + $0x150] sm:$0xff] }
  0x12   :  { %v84_v30 = vmax.f32 %v34_v26, 0.0  ;;  %v110_v32 = vmax.f32 %v60_v27, 0.0  ;;  %v36_v34 = vld [vmem:[%s1191_s0 + $0x98] sm:$0xff]  ;;  %v62_v35 = vld [vmem:[%s1191_s0 + $0x168] sm:$0xff]  ;;  %v35_v39 = vld [vmem:[%s1191_s0 + $0x90] sm:$0xff] }
  0x13   :  { %v61_v41 = vld [vmem:[%s1191_s0 + $0x160] sm:$0xff]  ;;  %v38_v42 = vld [vmem:[%s1191_s0 + $0xa8] sm:$0xff]  ;;  %v64_v43 = vld [vmem:[%s1191_s0 + $0x178] sm:$0xff] }
  0x14   :  { %652 = vmatpush1.bf16.msra.mxu0 %v651_v19  ;;  %678 = vmatpush1.bf16.msra.mxu1 %v651_v19  ;;  %v58_v19 = vld [vmem:[%s1191_s0 + $0x148] sm:$0xff]  ;;  %v37_v47 = vld [vmem:[%s1191_s0 + $0xa0] sm:$0xff]  ;;  %v63_v49 = vld [vmem:[%s1191_s0 + $0x170] sm:$0xff] }
  0x15   :  { %653 = vmatprep.subr.bf16.mxu0 %v686_v0  ;;  %670 = vmatprep.subr.bf16.mxu1 %v686_v0  ;;  %v108_v24 = vmax.f32 %v58_v19, 0.0  ;;  %v40_v50 = vld [vmem:[%s1191_s0 + $0xb8] sm:$0xff]  ;;  %v66_v51 = vld [vmem:[%s1191_s0 + $0x188] sm:$0xff]  ;;  %v39_v55 = vld [vmem:[%s1191_s0 + $0xb0] sm:$0xff] }
  0x16   :  { %v65_v57 = vld [vmem:[%s1191_s0 + $0x180] sm:$0xff]  ;;  %v42_v58 = vld [vmem:[%s1191_s0 + $0xc8] sm:$0xff] }
  0x18   :  { %655 = vmatpush1.bf16.msra.mxu0 %v654_v22  ;;  %679 = vmatpush1.bf16.msra.mxu1 %v654_v22  ;;  %v82_v22 = vmax.f32 %v32_v18, 0.0 }
  0x19   :  { %656 = vmatprep.subr.bf16.mxu0 %v686_v0  ;;  %671 = vmatprep.subr.bf16.mxu1 %v686_v0 }
  0x1c   :  { %658 = vmatpush1.bf16.msra.mxu0 %v657_v25  ;;  %680 = vmatpush1.bf16.msra.mxu1 %v657_v25  ;;  %v57_v25 = vld [vmem:[%s1191_s0 + $0x140] sm:$0xff] }
  0x1d   :  { %659 = vmatprep.subr.bf16.mxu0 %v686_v0  ;;  %672 = vmatprep.subr.bf16.mxu1 %v686_v0  ;;  %v107_v29 = vmax.f32 %v57_v25, 0.0 }
  0x20   :  { %661 = vmatpush1.bf16.msra.mxu0 %v660_v28  ;;  %681 = vmatpush1.bf16.msra.mxu1 %v660_v28  ;;  %v81_v28 = vmax.f32 %v31_v23, 0.0 }
  0x21   :  { %662 = vmatprep.subr.bf16.mxu0 %v686_v0  ;;  %673 = vmatprep.subr.bf16.mxu1 %v686_v0  ;;  %v102_v0 = vmax.f32 %v52_v59, 0.0  ;;  %v89_v59 = vmax.f32 %v39_v55, 0.0 }
  0x24   :  { %664 = vmatpush1.bf16.msra.mxu0 %v663_v31  ;;  %682 = vmatpush1.bf16.msra.mxu1 %v663_v31  ;;  %v33_v31 = vld [vmem:[%s1191_s0 + $0x80] sm:$0xff] }
  0x27   :  { %276 = vmatmul.mubr.f32.vlgmr.msra.gmra.mrb[0].mxu0 %v67_v36  ;;  %341 = vmatmul.mubr.f32.vlgmr.msra.gmra.mrb[0].mxu1 %v93_v37  ;;  %v83_v36 = vmax.f32 %v33_v31, 0.0  ;;  %v109_v37 = vmax.f32 %v59_v33, 0.0 }
  0x28   :  { %614 = vmatprep.mubr.msk.f32.mxu0 %vm135_vm0, %v70_v38  ;;  %627 = vmatprep.mubr.msk.f32.mxu1 %vm135_vm0, %v96_v40  ;;  %v86_v38 = vmax.f32 %v36_v34, 0.0  ;;  %v112_v40 = vmax.f32 %v62_v35, 0.0 }
  0x2b   :  { %281 = vmatmul.mubr.f32.gmra.mrb[2].mxu0 %v69_v44  ;;  %346 = vmatmul.mubr.f32.gmra.mrb[2].mxu1 %v95_v45  ;;  %v85_v44 = vmax.f32 %v35_v39, 0.0  ;;  %v111_v45 = vmax.f32 %v61_v41, 0.0 }
  0x2c   :  { %615 = vmatprep.mubr.msk.f32.mxu0 %vm135_vm0, %v72_v46  ;;  %628 = vmatprep.mubr.msk.f32.mxu1 %vm135_vm0, %v98_v48  ;;  %v88_v46 = vmax.f32 %v38_v42, 0.0  ;;  %v114_v48 = vmax.f32 %v64_v43, 0.0 }
  0x2f   :  { %286 = vmatmul.mubr.f32.gmra.mrb[4].mxu0 %v71_v52  ;;  %351 = vmatmul.mubr.f32.gmra.mrb[4].mxu1 %v97_v53  ;;  %v87_v52 = vmax.f32 %v37_v47, 0.0  ;;  %v113_v53 = vmax.f32 %v63_v49, 0.0 }
  0x30   :  { %616 = vmatprep.mubr.msk.f32.mxu0 %vm135_vm0, %v74_v54  ;;  %629 = vmatprep.mubr.msk.f32.mxu1 %vm135_vm0, %v100_v56  ;;  %v90_v54 = vmax.f32 %v40_v50, 0.0  ;;  %v116_v56 = vmax.f32 %v66_v51, 0.0 }
  0x33   :  { %291 = vmatmul.mubr.f32.gmra.mrb[6].mxu0 %v73_v60  ;;  %356 = vmatmul.mubr.f32.gmra.mrb[6].mxu1 %v99_v61  ;;  %v115_v60 = vmax.f32 %v65_v57, 0.0  ;;  %v92_v61 = vmax.f32 %v42_v58, 0.0 }
  0x34   :  { %617 = vmatprep.mubr.msk.f32.mxu0 %vm135_vm0, %v76_v62  ;;  %630 = vmatprep.mubr.msk.f32.mxu1 %vm135_vm0, %v102_v0  ;;  %v41_v62 = vld [vmem:[%s1191_s0 + $0xc0] sm:$0xff] }
  0x35   :  { %v91_v63 = vmax.f32 %v41_v62, 0.0 }
  0x37   :  { %296 = vmatmul.mubr.f32.gmra.mrb[8].mxu0 %v75_v4  ;;  %361 = vmatmul.mubr.f32.gmra.mrb[8].mxu1 %v101_v5 }
  0x38   :  { %618 = vmatprep.mubr.msk.f32.mxu0 %vm135_vm0, %v78_v6  ;;  %631 = vmatprep.mubr.msk.f32.mxu1 %vm135_vm0, %v104_v8 }
  0x3b   :  { %301 = vmatmul.mubr.f32.gmra.mrb[10].mxu0 %v77_v12  ;;  %366 = vmatmul.mubr.f32.gmra.mrb[10].mxu1 %v103_v13 }
  0x3c   :  { %619 = vmatprep.mubr.msk.f32.mxu0 %vm135_vm0, %v80_v14  ;;  %632 = vmatprep.mubr.msk.f32.mxu1 %vm135_vm0, %v106_v16 }
  0x3f   :  { %306 = vmatmul.mubr.f32.gmra.mrb[12].mxu0 %v79_v20  ;;  %371 = vmatmul.mubr.f32.gmra.mrb[12].mxu1 %v105_v21 }
  0x40   :  { %620 = vmatprep.mubr.msk.f32.mxu0 %vm135_vm0, %v82_v22  ;;  %633 = vmatprep.mubr.msk.f32.mxu1 %vm135_vm0, %v108_v24 }
  0x43   :  { %311 = vmatmul.mubr.f32.gmra.mrb[14].mxu0 %v81_v28  ;;  %376 = vmatmul.mubr.f32.gmra.mrb[14].mxu1 %v107_v29 }
  0x44   :  { %621 = vmatprep.mubr.msk.f32.mxu0 %vm135_vm0, %v84_v30  ;;  %634 = vmatprep.mubr.msk.f32.mxu1 %vm135_vm0, %v110_v32 }
  0x47   :  { %316 = vmatmul.mubr.f32.gmra.mrb[16].mxu0 %v83_v36  ;;  %381 = vmatmul.mubr.f32.gmra.mrb[16].mxu1 %v109_v37 }
  0x48   :  { %622 = vmatprep.mubr.msk.f32.mxu0 %vm135_vm0, %v86_v38  ;;  %635 = vmatprep.mubr.msk.f32.mxu1 %vm135_vm0, %v112_v40 }
  0x4b   :  { %321 = vmatmul.mubr.f32.gmra.mrb[18].mxu0 %v85_v44  ;;  %386 = vmatmul.mubr.f32.gmra.mrb[18].mxu1 %v111_v45 }
  0x4c   :  { %623 = vmatprep.mubr.msk.f32.mxu0 %vm135_vm0, %v88_v46  ;;  %636 = vmatprep.mubr.msk.f32.mxu1 %vm135_vm0, %v114_v48 }
  0x4f   :  { %326 = vmatmul.mubr.f32.gmra.mrb[20].mxu0 %v87_v52  ;;  %391 = vmatmul.mubr.f32.gmra.mrb[20].mxu1 %v113_v53 }
  0x50   :  { %624 = vmatprep.mubr.msk.f32.mxu0 %vm135_vm0, %v90_v54  ;;  %637 = vmatprep.mubr.msk.f32.mxu1 %vm135_vm0, %v116_v56 }
  0x53   :  { %331 = vmatmul.mubr.f32.gmra.mrb[22].mxu0 %v89_v59  ;;  %396 = vmatmul.mubr.f32.gmra.mrb[22].mxu1 %v115_v60 }
  0x54   :  { %625 = vmatprep.mubr.msk.f32.mxu0 %vm135_vm0, %v92_v61 }
  0x57   :  { %336 = vmatmul.mubr.f32.gmra.mrb[24].mxu0 %v91_v63 }
  0xfa   :  { %v959_v0 = vpop.f32.mrb[0].mxu0  ;;  %v961_v1 = vpop.f32.mrb[0].mxu1 }
  0xfb   :  { %v279_v2 = vpop.f32.mrb[1].mxu0  ;;  %v344_v3 = vpop.f32.mrb[1].mxu1  ;;  %v432_v6 = vmul.f32 %v959_v0, %v959_v0 }
  0xfe   :  { %v963_v4 = vpop.f32.mrb[2].mxu0  ;;  %v965_v5 = vpop.f32.mrb[2].mxu1 }
  0xff   :  { %v401_v7 = vadd.f32 %v963_v4, %v959_v0  ;;  %v433_v8 = vmul.f32 %v963_v4, %v963_v4  ;;  %v284_v9 = vpop.f32.mrb[3].mxu0  ;;  %v349_v10 = vpop.f32.mrb[3].mxu1 }
 0x101   :  { %v457_v11 = vadd.f32 %v433_v8, %v432_v6 }
 0x102   :  { %v973_v12 = vpop.f32.mrb[4].mxu0  ;;  %v975_v13 = vpop.f32.mrb[4].mxu1 }
 0x103   :  { %v402_v14 = vadd.f32 %v401_v7, %v973_v12  ;;  %v434_v15 = vmul.f32 %v973_v12, %v973_v12  ;;  %v289_v16 = vpop.f32.mrb[5].mxu0  ;;  %v354_v17 = vpop.f32.mrb[5].mxu1 }
 0x105   :  { %v458_v18 = vadd.f32 %v457_v11, %v434_v15 }
 0x106   :  { %v980_v19 = vpop.f32.mrb[6].mxu0  ;;  %v982_v20 = vpop.f32.mrb[6].mxu1 }
 0x107   :  { %v403_v21 = vadd.f32 %v402_v14, %v980_v19  ;;  %v435_v22 = vmul.f32 %v980_v19, %v980_v19  ;;  %v294_v23 = vpop.f32.mrb[7].mxu0  ;;  %v359_v24 = vpop.f32.mrb[7].mxu1 }
 0x109   :  { %v459_v25 = vadd.f32 %v458_v18, %v435_v22 }
 0x10a   :  { %v987_v26 = vpop.f32.mrb[8].mxu0  ;;  %v989_v27 = vpop.f32.mrb[8].mxu1 }
 0x10b   :  { %v404_v28 = vadd.f32 %v403_v21, %v987_v26  ;;  %v436_v29 = vmul.f32 %v987_v26, %v987_v26  ;;  %v299_v30 = vpop.f32.mrb[9].mxu0  ;;  %v364_v31 = vpop.f32.mrb[9].mxu1 }
 0x10d   :  { %v460_v32 = vadd.f32 %v459_v25, %v436_v29 }
 0x10e   :  { %v994_v33 = vpop.f32.mrb[10].mxu0  ;;  %v996_v34 = vpop.f32.mrb[10].mxu1 }
 0x10f   :  { %v405_v35 = vadd.f32 %v404_v28, %v994_v33  ;;  %v437_v36 = vmul.f32 %v994_v33, %v994_v33  ;;  %v304_v37 = vpop.f32.mrb[11].mxu0  ;;  %v369_v38 = vpop.f32.mrb[11].mxu1 }
 0x110   :  { %v446_v37 = vmul.f32 %v965_v5, %v965_v5 }
 0x111   :  { %v461_v39 = vadd.f32 %v460_v32, %v437_v36  ;;  %v445_v32 = vmul.f32 %v961_v1, %v961_v1 }
 0x112   :  { %v1001_v40 = vpop.f32.mrb[12].mxu0  ;;  %v1003_v41 = vpop.f32.mrb[12].mxu1 }
 0x113   :  { %v406_v42 = vadd.f32 %v405_v35, %v1001_v40  ;;  %v438_v43 = vmul.f32 %v1001_v40, %v1001_v40  ;;  %v309_v44 = vpop.f32.mrb[13].mxu0  ;;  %v374_v45 = vpop.f32.mrb[13].mxu1 }
 0x114   :  { %v448_v45 = vmul.f32 %v982_v20, %v982_v20 }
 0x115   :  { %v462_v46 = vadd.f32 %v461_v39, %v438_v43 }
 0x116   :  { %v1008_v47 = vpop.f32.mrb[14].mxu0  ;;  %v1010_v48 = vpop.f32.mrb[14].mxu1 }
 0x117   :  { %v407_v49 = vadd.f32 %v406_v42, %v1008_v47  ;;  %v439_v50 = vmul.f32 %v1008_v47, %v1008_v47  ;;  %v314_v51 = vpop.f32.mrb[15].mxu0  ;;  %v379_v52 = vpop.f32.mrb[15].mxu1  ;;  %v447_v42 = vmul.f32 %v975_v13, %v975_v13 }
 0x119   :  { %v463_v53 = vadd.f32 %v462_v46, %v439_v50  ;;  %v449_v50 = vmul.f32 %v989_v27, %v989_v27 }
 0x11a   :  { %v1015_v54 = vpop.f32.mrb[16].mxu0  ;;  %v1017_v55 = vpop.f32.mrb[16].mxu1 }
 0x11b   :  { %v408_v56 = vadd.f32 %v407_v49, %v1015_v54  ;;  %v440_v57 = vmul.f32 %v1015_v54, %v1015_v54  ;;  %v319_v58 = vpop.f32.mrb[17].mxu0  ;;  %v384_v59 = vpop.f32.mrb[17].mxu1 }
 0x11c   :  { %v451_v59 = vmul.f32 %v1003_v41, %v1003_v41 }
 0x11d   :  { %v464_v60 = vadd.f32 %v463_v53, %v440_v57  ;;  %v450_v53 = vmul.f32 %v996_v34, %v996_v34 }
 0x11e   :  { %v1022_v61 = vpop.f32.mrb[18].mxu0  ;;  %v1024_v62 = vpop.f32.mrb[18].mxu1 }
 0x11f   :  { %v409_v63 = vadd.f32 %v408_v56, %v1022_v61  ;;  %v441_v2 = vmul.f32 %v1022_v61, %v1022_v61  ;;  %v324_v3 = vpop.f32.mrb[19].mxu0  ;;  %v389_v6 = vpop.f32.mrb[19].mxu1 }
 0x120   :  { %v452_v3 = vmul.f32 %v1010_v48, %v1010_v48 }
 0x121   :  { %v465_v7 = vadd.f32 %v464_v60, %v441_v2 }
 0x122   :  { %v1029_v8 = vpop.f32.mrb[20].mxu0  ;;  %v1031_v9 = vpop.f32.mrb[20].mxu1 }
 0x123   :  { %v410_v10 = vadd.f32 %v409_v63, %v1029_v8  ;;  %v442_v11 = vmul.f32 %v1029_v8, %v1029_v8  ;;  %v329_v14 = vpop.f32.mrb[21].mxu0  ;;  %v394_v15 = vpop.f32.mrb[21].mxu1 }
 0x124   :  { %v454_v15 = vmul.f32 %v1024_v62, %v1024_v62 }
 0x125   :  { %v466_v16 = vadd.f32 %v465_v7, %v442_v11 }
 0x126   :  { %v1036_v17 = vpop.f32.mrb[22].mxu0  ;;  %v1038_v18 = vpop.f32.mrb[22].mxu1 }
 0x127   :  { %v411_v21 = vadd.f32 %v410_v10, %v1036_v17  ;;  %v443_v22 = vmul.f32 %v1036_v17, %v1036_v17  ;;  %v334_v23 = vpop.f32.mrb[23].mxu0  ;;  %v399_v24 = vpop.f32.mrb[23].mxu1  ;;  %v453_v10 = vmul.f32 %v1017_v55, %v1017_v55 }
 0x128   :  { %v456_v23 = vmul.f32 %v1038_v18, %v1038_v18 }
 0x129   :  { %v467_v25 = vadd.f32 %v466_v16, %v443_v22  ;;  %v455_v22 = vmul.f32 %v1031_v9, %v1031_v9 }
 0x12a   :  { %v1043_v28 = vpop.f32.mrb[24].mxu0 }
 0x12b   :  { %v412_v29 = vadd.f32 %v411_v21, %v1043_v28  ;;  %v444_v30 = vmul.f32 %v1043_v28, %v1043_v28  ;;  %v339_v31 = vpop.f32.mrb[25].mxu0 }
 0x12d   :  { %v413_v35 = vadd.f32 %v412_v29, %v961_v1  ;;  %v468_v36 = vadd.f32 %v467_v25, %v444_v30 }
 0x12f   :  { %v414_v38 = vadd.f32 %v413_v35, %v965_v5  ;;  %v469_v39 = vadd.f32 %v468_v36, %v445_v32 }
 0x131   :  { %v415_v43 = vadd.f32 %v414_v38, %v975_v13  ;;  %v470_v44 = vadd.f32 %v469_v39, %v446_v37 }
 0x133   :  { %v471_v46 = vadd.f32 %v470_v44, %v447_v42  ;;  %v416_v49 = vadd.f32 %v415_v43, %v982_v20 }
 0x135   :  { %v417_v51 = vadd.f32 %v416_v49, %v989_v27  ;;  %v472_v52 = vadd.f32 %v471_v46, %v448_v45 }
 0x137   :  { %v418_v56 = vadd.f32 %v417_v51, %v996_v34  ;;  %v473_v57 = vadd.f32 %v472_v52, %v449_v50 }
 0x139   :  { %v419_v58 = vadd.f32 %v418_v56, %v1003_v41  ;;  %v474_v60 = vadd.f32 %v473_v57, %v450_v53  ;;  %v498_v53 = vlaneseq  ;;  %v492_v57 = vld [vmem:[%s1192_s2] sm:$0x1] }
 0x13b   :  { %v475_v63 = vadd.f32 %v474_v60, %v451_v59  ;;  %v420_v2 = vadd.f32 %v419_v58, %v1010_v48  ;;  %v499_v56 = vshrl.u32 %v498_v53, 7 }
 0x13d   :  { %v476_v6 = vadd.f32 %v475_v63, %v452_v3  ;;  %v421_v7 = vadd.f32 %v420_v2, %v1017_v55  ;;  %v500_v58 = vsub.s32 0, %v499_v56  ;;  %v494_v63 = vld [vmem:[%s1193_s3] sm:$0x1] }
 0x13f   :  { %v477_v11 = vadd.f32 %v476_v6, %v453_v10  ;;  %v422_v14 = vadd.f32 %v421_v7, %v1024_v62 }
 0x141   :  { %v478_v16 = vadd.f32 %v477_v11, %v454_v15  ;;  %v423_v21 = vadd.f32 %v422_v14, %v1031_v9 }
 0x143   :  { %v479_v24 = vadd.f32 %v478_v16, %v455_v22  ;;  %v424_v25 = vadd.f32 %v423_v21, %v1038_v18 }
 0x145   :  { %v425_v29 = vrot.slane %v424_v25, 4  ;;  %v480_v30 = vadd.f32 %v479_v24, %v456_v23 }
 0x147   :  { %v426_v31 = vadd.f32 %v425_v29, %v424_v25  ;;  %v481_v32 = vrot.slane %v480_v30, 4 }
 0x149   :  { %v427_v35 = vrot.slane %v426_v31, 2  ;;  %v482_v36 = vadd.f32 %v481_v32, %v480_v30 }
 0x14b   :  { %v428_v37 = vadd.f32 %v427_v35, %v426_v31  ;;  %v483_v38 = vrot.slane %v482_v36, 2 }
 0x14d   :  { %v429_v39 = vrot.slane %v428_v37, 1  ;;  %v484_v42 = vadd.f32 %v483_v38, %v482_v36 }
 0x14f   :  { %v430_v43 = vadd.f32 %v429_v39, %v428_v37  ;;  %v485_v44 = vrot.slane %v484_v42, 1 }
 0x151   :  { %v431_v45 = vmul.f32 0.0051020407, %v430_v43  ;;  %v486_v46 = vadd.f32 %v485_v44, %v484_v42 }
 0x153   :  { %v487_v49 = vmul.f32 0.0051020407, %v486_v46  ;;  %v488_v50 = vmul.f32 %v431_v45, %v431_v45 }
 0x155   :  { %v489_v51 = vsub.f32 %v487_v49, %v488_v50 }
 0x157   :  { %v490_v52 = vadd.f32 0.001, %v489_v51 }
 0x159   :  { %684 = vrsqrt.f32 %v490_v52 }
 0x163   :  { %v685_v59 = vpop.eup %684 }
 0x164   :  { %v493_v60 = vmul.f32 %v685_v59, %v492_v57 }
 0x166   :  { %v495_v2 = vmul.f32 %v493_v60, %v431_v45  ;;  %v501_v3 = vrot.slane %v493_v60, %v500_v58 }
 0x168   :  { %v496_v6 = vsub.f32 %v494_v63, %v495_v2  ;;  %v503_v7 = vmul.f32 %v501_v3, %v959_v0  ;;  %v504_v10 = vmul.f32 %v501_v3, %v963_v4  ;;  %v505_v11 = vmul.f32 %v501_v3, %v973_v12 }
 0x169   :  { %v506_v14 = vmul.f32 %v501_v3, %v980_v19  ;;  %v507_v15 = vmul.f32 %v501_v3, %v987_v26  ;;  %v508_v16 = vmul.f32 %v501_v3, %v994_v33  ;;  %v509_v21 = vmul.f32 %v501_v3, %v1001_v40 }
 0x16a   :  { %v510_v22 = vmul.f32 %v501_v3, %v1008_v47  ;;  %v511_v23 = vmul.f32 %v501_v3, %v1015_v54  ;;  %v512_v24 = vmul.f32 %v501_v3, %v1022_v61  ;;  %v513_v0 = vmul.f32 %v501_v3, %v1029_v8 }
 0x16b   :  { %v514_v4 = vmul.f32 %v501_v3, %v1036_v17  ;;  %v515_v12 = vmul.f32 %v501_v3, %v1043_v28  ;;  %v516_v19 = vmul.f32 %v501_v3, %v961_v1  ;;  %v517_v26 = vmul.f32 %v501_v3, %v965_v5 }
 0x16c   :  { %v518_v33 = vmul.f32 %v501_v3, %v975_v13  ;;  %v519_v40 = vmul.f32 %v501_v3, %v982_v20  ;;  %v520_v47 = vmul.f32 %v501_v3, %v989_v27  ;;  %v521_v54 = vmul.f32 %v501_v3, %v996_v34 }
 0x16d   :  { %v522_v61 = vmul.f32 %v501_v3, %v1003_v41  ;;  %v523_v8 = vmul.f32 %v501_v3, %v1010_v48  ;;  %v524_v17 = vmul.f32 %v501_v3, %v1017_v55  ;;  %v525_v28 = vmul.f32 %v501_v3, %v1024_v62 }
 0x16e   :  { %v526_v1 = vmul.f32 %v501_v3, %v1031_v9  ;;  %v527_v5 = vmul.f32 %v501_v3, %v1038_v18  ;;  %v532_v25 = vrot.slane %v496_v6, %v500_v58 }
 0x170   :  { %v534_v13 = vadd.f32 %v532_v25, %v503_v7  ;;  %v535_v29 = vadd.f32 %v532_v25, %v504_v10  ;;  %v536_v20 = vadd.f32 %v532_v25, %v505_v11  ;;  %v537_v30 = vadd.f32 %v532_v25, %v506_v14 }
 0x171   :  { %v538_v27 = vadd.f32 %v532_v25, %v507_v15  ;;  %v539_v31 = vadd.f32 %v532_v25, %v508_v16  ;;  %v540_v34 = vadd.f32 %v532_v25, %v509_v21  ;;  %v541_v32 = vadd.f32 %v532_v25, %v510_v22 }
 0x172   :  { %v542_v41 = vadd.f32 %v532_v25, %v511_v23  ;;  %v543_v35 = vadd.f32 %v532_v25, %v512_v24  ;;  %v544_v48 = vadd.f32 %v532_v25, %v513_v0  ;;  %v545_v36 = vadd.f32 %v532_v25, %v514_v4 }
 0x173   :  { %v546_v55 = vadd.f32 %v532_v25, %v515_v12  ;;  %v547_v37 = vadd.f32 %v532_v25, %v516_v19  ;;  %v548_v62 = vadd.f32 %v532_v25, %v517_v26  ;;  %v549_v38 = vadd.f32 %v532_v25, %v518_v33 }
 0x174   :  { %v550_v9 = vadd.f32 %v532_v25, %v519_v40  ;;  %v551_v39 = vadd.f32 %v532_v25, %v520_v47  ;;  %v552_v18 = vadd.f32 %v532_v25, %v521_v54  ;;  %v553_v42 = vadd.f32 %v532_v25, %v522_v61 }
 0x175   :  { %v554_v43 = vadd.f32 %v532_v25, %v523_v8  ;;  %v555_v44 = vadd.f32 %v532_v25, %v524_v17  ;;  %v556_v45 = vadd.f32 %v532_v25, %v525_v28  ;;  %v557_v46 = vadd.f32 %v532_v25, %v526_v1 }
 0x176   :  { %v558_v49 = vadd.f32 %v532_v25, %v527_v5  ;;  %v559_v50 = vmax.f32 %v534_v13, 0.0  ;;  %v560_v51 = vmax.f32 %v535_v29, 0.0  ;;  %v561_v52 = vmax.f32 %v536_v20, 0.0 }
 0x177   :  { %v562_v53 = vmax.f32 %v537_v30, 0.0  ;;  %v563_v56 = vmax.f32 %v538_v27, 0.0  ;;  %v564_v57 = vmax.f32 %v539_v31, 0.0  ;;  %v565_v58 = vmax.f32 %v540_v34, 0.0 }
 0x178   :  { %v566_v59 = vmax.f32 %v541_v32, 0.0  ;;  %v567_v60 = vmax.f32 %v542_v41, 0.0  ;;  %v568_v63 = vmax.f32 %v543_v35, 0.0  ;;  %v569_v2 = vmax.f32 %v544_v48, 0.0  ;;  %584 = vst [vmem:[%s1194_s4] sm:$0xff] %v559_v50  ;;  %585 = vst [vmem:[%s1194_s4 + $0x8] sm:$0xff] %v560_v51 }
 0x179   :  { %586 = vst [vmem:[%s1194_s4 + $0x10] sm:$0xff] %v561_v52  ;;  %v570_v3 = vmax.f32 %v545_v36, 0.0  ;;  %v571_v6 = vmax.f32 %v546_v55, 0.0  ;;  %v572_v7 = vmax.f32 %v547_v37, 0.0  ;;  %v573_v10 = vmax.f32 %v548_v62, 0.0  ;;  %587 = vst [vmem:[%s1194_s4 + $0x18] sm:$0xff] %v562_v53 }
 0x17a   :  { %588 = vst [vmem:[%s1194_s4 + $0x20] sm:$0xff] %v563_v56  ;;  %589 = vst [vmem:[%s1194_s4 + $0x28] sm:$0xff] %v564_v57  ;;  %v574_v11 = vmax.f32 %v549_v38, 0.0  ;;  %v575_v14 = vmax.f32 %v550_v9, 0.0  ;;  %v576_v15 = vmax.f32 %v551_v39, 0.0  ;;  %v577_v16 = vmax.f32 %v552_v18, 0.0 }
 0x17b   :  { %590 = vst [vmem:[%s1194_s4 + $0x30] sm:$0xff] %v565_v58  ;;  %591 = vst [vmem:[%s1194_s4 + $0x38] sm:$0xff] %v566_v59  ;;  %v578_v21 = vmax.f32 %v553_v42, 0.0  ;;  %v579_v22 = vmax.f32 %v554_v43, 0.0  ;;  %v580_v23 = vmax.f32 %v555_v44, 0.0  ;;  %v581_v24 = vmax.f32 %v556_v45, 0.0 }
 0x17c   :  { %592 = vst [vmem:[%s1194_s4 + $0x40] sm:$0xff] %v567_v60  ;;  %593 = vst [vmem:[%s1194_s4 + $0x48] sm:$0xff] %v568_v63  ;;  %v582_v0 = vmax.f32 %v557_v46, 0.0  ;;  %v583_v4 = vmax.f32 %v558_v49, 0.0 }
 0x17d   :  { %594 = vst [vmem:[%s1194_s4 + $0x50] sm:$0xff] %v569_v2  ;;  %595 = vst [vmem:[%s1194_s4 + $0x58] sm:$0xff] %v570_v3 }
 0x17e   :  { %596 = vst [vmem:[%s1194_s4 + $0x60] sm:$0xff] %v571_v6  ;;  %597 = vst [vmem:[%s1194_s4 + $0x68] sm:$0xff] %v572_v7 }
 0x17f   :  { %598 = vst [vmem:[%s1194_s4 + $0x70] sm:$0xff] %v573_v10  ;;  %599 = vst [vmem:[%s1194_s4 + $0x78] sm:$0xff] %v574_v11 }
 0x180   :  { %600 = vst [vmem:[%s1194_s4 + $0x80] sm:$0xff] %v575_v14  ;;  %601 = vst [vmem:[%s1194_s4 + $0x88] sm:$0xff] %v576_v15 }
 0x181   :  { %602 = vst [vmem:[%s1194_s4 + $0x90] sm:$0xff] %v577_v16  ;;  %603 = vst [vmem:[%s1194_s4 + $0x98] sm:$0xff] %v578_v21 }
 0x182   :  { %604 = vst [vmem:[%s1194_s4 + $0xa0] sm:$0xff] %v579_v22  ;;  %605 = vst [vmem:[%s1194_s4 + $0xa8] sm:$0xff] %v580_v23 }
 0x183   :  { %606 = vst [vmem:[%s1194_s4 + $0xb0] sm:$0xff] %v581_v24  ;;  %607 = vst [vmem:[%s1194_s4 + $0xb8] sm:$0xff] %v582_v0 }
 0x184   :  { %608 = vst [vmem:[%s1194_s4 + $0xc0] sm:$0xff] %v583_v4 }

</bundles_post_ra>
